<compile_context>
chip_gen: v5e
topology: v5e:2x2
jax: 0.10.0
libtpu: 0.0.40
codegen_flags: <defaults>
</compile_context>

<pallas_src>
import jax
import jax.numpy as jnp
from jax import lax
from jax.experimental import pallas as pl
from jax.experimental.pallas import tpu as pltpu


def _round_up(x, m):
    return ((x + m - 1) // m) * m


def _vmem_budget_bytes():
    """Generation-aware VMEM budget: ~48 MiB on v7x (64 MiB/TC), ~96 MiB on v5e/v6e."""
    cap = 64 * 1024 * 1024  # conservative fallback (v7x per-TC VMEM)
    try:
        cap = int(pltpu.get_tpu_info().vmem_capacity_bytes)
    except Exception:
        pass
    return (cap * 3) // 4


def _pick_tiles(M, K, Cout, in_bytes, out_bytes, budget, force_tile_k=None):
    """Choose (tile_m, Mp, tile_k, Kp, nk, Cp) so the working set fits `budget`."""
    Cp = _round_up(Cout, 128)          # lane-dense output -> unmasked stores
    Kp_full = _round_up(K, 128)        # lane-aligned contraction dim

    # ---- K tiling: bound the weight block (plus its buffers) ----
    w_budget = max(budget // 3, 128 * Cp * in_bytes)
    if force_tile_k is not None:
        tile_k = _round_up(min(force_tile_k, Kp_full), 128)
    elif Kp_full * Cp * in_bytes <= w_budget:
        tile_k = Kp_full                                   # single K step
    else:
        tile_k = max(128, (w_budget // (2 * Cp * in_bytes)) // 128 * 128)
    Kp = _round_up(K, tile_k)
    nk = Kp // tile_k
    w_bufs = 1 if nk == 1 else 2                           # Buffered(1) when invariant
    resident = w_bufs * tile_k * Cp * in_bytes + Cp * 4    # weights + bias

    # ---- M tiling: 2x patch tile + 2x output tile + f32 accumulator ----
    per_row = 2 * tile_k * in_bytes + 2 * Cp * out_bytes + Cp * 4
    avail = max(budget - resident, 16 * per_row)
    tile_m = min(avail // per_row, 2048)
    tile_m = min(tile_m, _round_up(M, 16))

    # >=4 (even) M-steps when M allows (pipelining + v7x dual TC), >=128 rows
    if M >= 4 * 128:
        tile_m = min(tile_m, max(128, _round_up(-(-M // 4), 16)))
    elif M >= 32:
        tile_m = min(tile_m, max(16, _round_up(-(-M // 2), 16)))
    tile_m = max(16, (tile_m // 16) * 16)                  # bf16 sublane pack (16,128)
    if tile_m >= 512:
        tile_m = (tile_m // 256) * 256                     # clean 256-row MXU passes
    Mp = _round_up(M, tile_m)
    return tile_m, Mp, tile_k, Kp, nk, Cp


def _aspp_matmul_kernel(p_ref, w_ref, b_ref, o_ref, acc_ref):
    """Fused (im2col patches) x (BN-folded weights) matmul + bias + ReLU.

    p_ref:   (TM, TK) bf16 activation patches
    w_ref:   (TK, Cp) bf16 weights with BN scale pre-folded
    b_ref:   (1,  Cp) f32 BN bias
    o_ref:   (TM, Cp) bf16 output (lane-dense, unmasked stores)
    acc_ref: (TM, Cp) f32 VMEM accumulator (persists across the K grid axis)
    """
    k = pl.program_id(1)

    @pl.when(k == 0)
    def _():
        acc_ref[...] = jnp.zeros_like(acc_ref)

    acc_ref[...] += jnp.dot(p_ref[...], w_ref[...],
                            preferred_element_type=jnp.float32)

    @pl.when(k == pl.num_programs(1) - 1)
    def _():
        o_ref[...] = jnp.maximum(acc_ref[...] + b_ref[...], 0.0).astype(o_ref.dtype)


def _run_matmul(patches2d, w2d, bias2d, *, tile_m, tile_k, nk, Mp, Kp, Cp,
                out_dtype, vmem_limit):
    grid = (Mp // tile_m, nk)

    def build(use_buffered):
        w_kw, b_kw = {}, {}
        if use_buffered:
            # Weights are grid-invariant when nk == 1 -> single buffer;
            # bias index_map is always constant -> single buffer.
            w_kw = dict(pipeline_mode=pl.Buffered(1 if nk == 1 else 2))
            b_kw = dict(pipeline_mode=pl.Buffered(1))
        return pl.pallas_call(
            _aspp_matmul_kernel,
            out_shape=jax.ShapeDtypeStruct((Mp, Cp), out_dtype),
            grid=grid,
            in_specs=[
                pl.BlockSpec((tile_m, tile_k), lambda i, k: (i, k)),
                pl.BlockSpec((tile_k, Cp), lambda i, k: (k, 0), **w_kw),
                pl.BlockSpec((1, Cp), lambda i, k: (0, 0), **b_kw),
            ],
            out_specs=pl.BlockSpec((tile_m, Cp), lambda i, k: (i, 0)),
            scratch_shapes=[pltpu.VMEM((tile_m, Cp), jnp.float32)],
            compiler_params=pltpu.CompilerParams(
                dimension_semantics=("parallel", "arbitrary"),
                vmem_limit_bytes=int(vmem_limit)),
        )

    try:
        return build(use_buffered=True)(patches2d, w2d, bias2d)
    except Exception:
        # Fallback for jax versions without BlockSpec pipeline_mode support.
        return build(use_buffered=False)(patches2d, w2d, bias2d)


def aspp_forward(x_nchw, w_oihw, gamma, beta, running_mean, running_var,
                 *, padding, dilation, eps=1e-5, compute_dtype=jnp.bfloat16,
                 _force_tile_k=None):
    N, Cin, H, W = x_nchw.shape
    Cout, _, KH, KW = w_oihw.shape
    Ho = H + 2 * padding - dilation * (KH - 1)
    Wo = W + 2 * padding - dilation * (KW - 1)

    # ---------- glue: NHWC, EARLY bf16 cast, spatial pad, im2col ----------
    x_nhwc = jnp.transpose(x_nchw, (0, 2, 3, 1)).astype(compute_dtype)
    xp = jnp.pad(x_nhwc, ((0, 0), (padding, padding), (padding, padding), (0, 0)))
    taps = [xp[:, kh * dilation:kh * dilation + Ho,
                  kw * dilation:kw * dilation + Wo, :]
            for kh in range(KH) for kw in range(KW)]
    patches = jnp.concatenate(taps, axis=-1)          # (N, Ho, Wo, KH*KW*Cin) bf16
    K = KH * KW * Cin
    M = N * Ho * Wo
    patches2d = patches.reshape(M, K)

    # ---------- fold eval-mode BN into weights; per-channel bias ----------
    inv_std = 1.0 / jnp.sqrt(running_var.astype(jnp.float32) + eps)
    scale = gamma.astype(jnp.float32) * inv_std
    bias = beta.astype(jnp.float32) - running_mean.astype(jnp.float32) * scale
    w_hwio = jnp.transpose(w_oihw, (2, 3, 1, 0)).astype(jnp.float32)  # (KH,KW,Cin,Cout)
    w2d = (w_hwio * scale[None, None, None, :]).reshape(K, Cout)

    # ---------- TPU-friendly padding + generation-aware tiling ----------
    in_bytes = jnp.dtype(compute_dtype).itemsize
    out_dtype = compute_dtype                          # bf16 writeback
    out_bytes = jnp.dtype(out_dtype).itemsize
    budget = _vmem_budget_bytes()
    tile_m, Mp, tile_k, Kp, nk, Cp = _pick_tiles(
        M, K, Cout, in_bytes, out_bytes, budget, force_tile_k=_force_tile_k)

    patches2d = jnp.pad(patches2d, ((0, Mp - M), (0, Kp - K)))          # bf16
    w2d = jnp.pad(w2d, ((0, Kp - K), (0, Cp - Cout))).astype(compute_dtype)
    bias2d = jnp.pad(bias.reshape(1, Cout), ((0, 0), (0, Cp - Cout)))   # f32

    out2d = _run_matmul(patches2d, w2d, bias2d, tile_m=tile_m, tile_k=tile_k,
                        nk=nk, Mp=Mp, Kp=Kp, Cp=Cp, out_dtype=out_dtype,
                        vmem_limit=budget)

    out_nhwc = out2d[:M, :Cout].reshape(N, Ho, Wo, Cout)
    # transpose while still bf16 (half the bytes), then cast to caller dtype
    return jnp.transpose(out_nhwc, (0, 3, 1, 2)).astype(x_nchw.dtype)   # NCHW


def _reference_forward_f32(x, w_oihw, gamma, beta, mean, var, *, padding, dilation, eps=1e-5):
    """Module-faithful f32 path: conv -> eval-mode BN -> ReLU."""
    y = lax.conv_general_dilated(
        x, w_oihw, window_strides=(1, 1),
        padding=((padding, padding), (padding, padding)),
        rhs_dilation=(dilation, dilation),
        dimension_numbers=("NCHW", "OIHW", "NCHW"))
    inv_std = 1.0 / jnp.sqrt(var + eps)
    scale = (gamma * inv_std)[None, :, None, None]
    shift = (beta - mean * gamma * inv_std)[None, :, None, None]
    return jnp.maximum(y * scale + shift, 0.0)


def _reference_forward_matched(x, w_oihw, gamma, beta, mean, var, *, padding, dilation,
                               eps=1e-5, compute_dtype=jnp.bfloat16):
    """Same bf16 quantization / BN folding as the kernel path (tight check)."""
    inv_std = 1.0 / jnp.sqrt(var + eps)
    scale = gamma * inv_std
    shift = beta - mean * scale
    w_folded = (w_oihw * scale[:, None, None, None]).astype(compute_dtype)
    y = lax.conv_general_dilated(
        x.astype(compute_dtype), w_folded, window_strides=(1, 1),
        padding=((padding, padding), (padding, padding)),
        rhs_dilation=(dilation, dilation),
        dimension_numbers=("NCHW", "OIHW", "NCHW"),
        preferred_element_type=jnp.float32)
    return jnp.maximum(y + shift[None, :, None, None], 0.0)


def _run_case(key, N, Cin, H, W, Cout, KH, KW, padding, dilation, force_tile_k=None):
    kx, kw = jax.random.split(key)
    x = jax.random.normal(kx, (N, Cin, H, W), dtype=jnp.float32)

    # kaiming_normal_ (fan_in, relu gain): std = sqrt(2 / (Cin * KH * KW))
    fan_in = Cin * KH * KW
    w = jax.random.normal(kw, (Cout, Cin, KH, KW), dtype=jnp.float32) * jnp.sqrt(2.0 / fan_in)

    # BatchNorm2d init: weight=1, bias=0, running_mean=0, running_var=1
    gamma = jnp.ones((Cout,), jnp.float32)
    beta = jnp.zeros((Cout,), jnp.float32)
    running_mean = jnp.zeros((Cout,), jnp.float32)
    running_var = jnp.ones((Cout,), jnp.float32)

    out = aspp_forward(x, w, gamma, beta, running_mean, running_var,
                       padding=padding, dilation=dilation, _force_tile_k=force_tile_k)
    out = jax.block_until_ready(out)
    Ho = H + 2 * padding - dilation * (KH - 1)
    Wo = W + 2 * padding - dilation * (KW - 1)
    assert out.shape == (N, Cout, Ho, Wo), out.shape

    # Tight check vs a reference with identical bf16 folding (kernel output is
    # bf16, so allow ~1 bf16 ulp of slack).
    ref_m = _reference_forward_matched(x, w, gamma, beta, running_mean, running_var,
                                       padding=padding, dilation=dilation)
    err_m = float(jnp.max(jnp.abs(out - ref_m)))
    assert jnp.allclose(out, ref_m, rtol=2e-2, atol=2e-2), err_m

    # Loose sanity check vs the pure-f32 module-faithful path.
    ref_f = _reference_forward_f32(x, w, gamma, beta, running_mean, running_var,
                                   padding=padding, dilation=dilation)
    err_f = float(jnp.max(jnp.abs(out - ref_f)))
    assert jnp.allclose(out, ref_f, rtol=5e-2, atol=5e-2), err_f


if __name__ == "__main__":
    key = jax.random.PRNGKey(0)
    k1, k2 = jax.random.split(key)

    # Small _ASPPModule config: inplanes=4, planes=8, kernel_size=3, padding=2, dilation=2
    _run_case(k1, N=2, Cin=4, H=16, W=16, Cout=8, KH=3, KW=3, padding=2, dilation=2)

    # Second config with a forced small K tile to exercise the K-reduction
    # (accumulator) grid axis that large-Cin backbones would use.
    _run_case(k2, N=2, Cin=32, H=16, W=16, Cout=8, KH=3, KW=3, padding=2, dilation=2,
              force_tile_k=128)

    print("KERNEL_OK")
</pallas_src>

<mosaic_0001>
module attributes {stable_mosaic.version = 11 : i64} {
  func.func @_aspp_matmul_kernel(%arg0: i32, %arg1: i32, %arg2: memref<128x128xbf16, #tpu.memory_space<vmem>>, %arg3: memref<128x128xbf16, #tpu.memory_space<vmem>>, %arg4: memref<1x128xf32, #tpu.memory_space<vmem>>, %arg5: memref<128x128xbf16, #tpu.memory_space<vmem>>, %arg6: memref<128x128xf32, #tpu.memory_space<vmem>>) attributes {dimension_semantics = [#tpu.dimension_semantics<parallel>, #tpu.dimension_semantics<arbitrary>], iteration_bounds = array<i64: 4, 1>, scalar_prefetch = 0 : i64, scratch_operands = 1 : i64, tpu.core_type = #tpu.core_type<tc>, window_params = [{transform_indices = @transform_0, window_bounds = array<i64: 128, 128>}, {pipeline_mode = #tpu.pipeline_mode<synchronous>, transform_indices = @transform_1, window_bounds = array<i64: 128, 128>}, {pipeline_mode = #tpu.pipeline_mode<synchronous>, transform_indices = @transform_2, window_bounds = array<i64: 1, 128>}, {transform_indices = @transform_3, window_bounds = array<i64: 128, 128>}]} {
    %c0_i32 = arith.constant 0 : i32
    %0 = arith.cmpi eq, %arg1, %c0_i32 : i32
    %1 = arith.extui %0 : i1 to i32
    %c0_i32_0 = arith.constant 0 : i32
    %2 = arith.cmpi ne, %1, %c0_i32_0 : i32
    scf.if %2 {
      %cst_10 = arith.constant 0.000000e+00 : f32
      %12 = vector.broadcast %cst_10 : f32 to vector<128x128xf32>
      %c0_11 = arith.constant 0 : index
      %c0_12 = arith.constant 0 : index
      %13 = vector.load %arg6[%c0_11, %c0_12] : memref<128x128xf32, #tpu.memory_space<vmem>>, vector<128x128xf32>
      tpu.vector_store %arg6[%c0_11, %c0_12], %12 {strides = array<i32>} : memref<128x128xf32, #tpu.memory_space<vmem>>, vector<128x128xf32>,
    } else {
    }
    %c0 = arith.constant 0 : index
    %c0_1 = arith.constant 0 : index
    %3 = vector.load %arg6[%c0, %c0_1] : memref<128x128xf32, #tpu.memory_space<vmem>>, vector<128x128xf32>
    %c0_2 = arith.constant 0 : index
    %c0_3 = arith.constant 0 : index
    %4 = vector.load %arg2[%c0_2, %c0_3] : memref<128x128xbf16, #tpu.memory_space<vmem>>, vector<128x128xbf16>
    %c0_4 = arith.constant 0 : index
    %c0_5 = arith.constant 0 : index
    %5 = vector.load %arg3[%c0_4, %c0_5] : memref<128x128xbf16, #tpu.memory_space<vmem>>, vector<128x128xbf16>
    %cst = arith.constant dense<0.000000e+00> : vector<128x128xf32>
    %6 = tpu.matmul %4, %5, %cst {dimension_numbers = #tpu.dot_dimension_numbers<[1], [0], [0], [1], [0, 0, 1, 1], [], []>} : vector<128x128xbf16>, vector<128x128xbf16>, vector<128x128xf32> -> vector<128x128xf32>
    %7 = arith.addf %3, %6 : vector<128x128xf32>
    %c0_6 = arith.constant 0 : index
    %c0_7 = arith.constant 0 : index
    %8 = vector.load %arg6[%c0_6, %c0_7] : memref<128x128xf32, #tpu.memory_space<vmem>>, vector<128x128xf32>
    tpu.vector_store %arg6[%c0_6, %c0_7], %7 {strides = array<i32>} : memref<128x128xf32, #tpu.memory_space<vmem>>, vector<128x128xf32>,
    %c0_i32_8 = arith.constant 0 : i32
    %9 = arith.cmpi eq, %arg1, %c0_i32_8 : i32
    %10 = arith.extui %9 : i1 to i32
    %c0_i32_9 = arith.constant 0 : i32
    %11 = arith.cmpi ne, %10, %c0_i32_9 : i32
    scf.if %11 {
      %c0_10 = arith.constant 0 : index
      %c0_11 = arith.constant 0 : index
      %12 = vector.load %arg6[%c0_10, %c0_11] : memref<128x128xf32, #tpu.memory_space<vmem>>, vector<128x128xf32>
      %c0_12 = arith.constant 0 : index
      %c0_13 = arith.constant 0 : index
      %13 = vector.load %arg4[%c0_12, %c0_13] : memref<1x128xf32, #tpu.memory_space<vmem>>, vector<1x128xf32>
      %14 = vector.broadcast %13 : vector<1x128xf32> to vector<128x128xf32>
      %15 = arith.addf %12, %14 : vector<128x128xf32>
      %cst_14 = arith.constant 0.000000e+00 : f32
      %16 = vector.broadcast %cst_14 : f32 to vector<128x128xf32>
      %17 = arith.maximumf %15, %16 : vector<128x128xf32>
      %18 = arith.truncf %17 : vector<128x128xf32> to vector<128x128xbf16>
      %c0_15 = arith.constant 0 : index
      %c0_16 = arith.constant 0 : index
      %19 = vector.load %arg5[%c0_15, %c0_16] : memref<128x128xbf16, #tpu.memory_space<vmem>>, vector<128x128xbf16>
      tpu.vector_store %arg5[%c0_15, %c0_16], %18 {strides = array<i32>} : memref<128x128xbf16, #tpu.memory_space<vmem>>, vector<128x128xbf16>,
    } else {
    }
    return
  }
  func.func @transform_0(%arg0: i32, %arg1: i32) -> (i32, i32) {
    %c0_i32 = arith.constant 0 : i32
    return %arg0, %arg1 : i32, i32
  }
  func.func @transform_1(%arg0: i32, %arg1: i32) -> (i32, i32) {
    %c0_i32 = arith.constant 0 : i32
    %c0_i32_0 = arith.constant 0 : i32
    return %arg1, %c0_i32 : i32, i32
  }
  func.func @transform_2(%arg0: i32, %arg1: i32) -> (i32, i32) {
    %c0_i32 = arith.constant 0 : i32
    %c0_i32_0 = arith.constant 0 : i32
    %c0_i32_1 = arith.constant 0 : i32
    return %c0_i32, %c0_i32_0 : i32, i32
  }
  func.func @transform_3(%arg0: i32, %arg1: i32) -> (i32, i32) {
    %c0_i32 = arith.constant 0 : i32
    %c0_i32_0 = arith.constant 0 : i32
    return %arg0, %c0_i32 : i32, i32
  }
}

module attributes {stable_mosaic.version = 11 : i64} {
  func.func @_aspp_matmul_kernel(%arg0: i32, %arg1: i32, %arg2: memref<128x128xbf16, #tpu.memory_space<vmem>>, %arg3: memref<128x128xbf16, #tpu.memory_space<vmem>>, %arg4: memref<1x128xf32, #tpu.memory_space<vmem>>, %arg5: memref<128x128xbf16, #tpu.memory_space<vmem>>, %arg6: memref<128x128xf32, #tpu.memory_space<vmem>>) attributes {dimension_semantics = [#tpu.dimension_semantics<parallel>, #tpu.dimension_semantics<arbitrary>], iteration_bounds = array<i64: 4, 1>, scalar_prefetch = 0 : i64, scratch_operands = 1 : i64, tpu.core_type = #tpu.core_type<tc>, window_params = [{transform_indices = @transform_0, window_bounds = array<i64: 128, 128>}, {transform_indices = @transform_1, window_bounds = array<i64: 128, 128>}, {pipeline_mode = #tpu.pipeline_mode<synchronous>, transform_indices = @transform_2, window_bounds = array<i64: 1, 128>}, {transform_indices = @transform_3, window_bounds = array<i64: 128, 128>}]} {
    %c0_i32 = arith.constant 0 : i32
    %0 = arith.cmpi eq, %arg1, %c0_i32 : i32
    %1 = arith.extui %0 : i1 to i32
    %c0_i32_0 = arith.constant 0 : i32
    %2 = arith.cmpi ne, %1, %c0_i32_0 : i32
    scf.if %2 {
      %cst_10 = arith.constant 0.000000e+00 : f32
      %12 = vector.broadcast %cst_10 : f32 to vector<128x128xf32>
      %c0_11 = arith.constant 0 : index
      %c0_12 = arith.constant 0 : index
      %13 = vector.load %arg6[%c0_11, %c0_12] : memref<128x128xf32, #tpu.memory_space<vmem>>, vector<128x128xf32>
      tpu.vector_store %arg6[%c0_11, %c0_12], %12 {strides = array<i32>} : memref<128x128xf32, #tpu.memory_space<vmem>>, vector<128x128xf32>,
    } else {
    }
    %c0 = arith.constant 0 : index
    %c0_1 = arith.constant 0 : index
    %3 = vector.load %arg6[%c0, %c0_1] : memref<128x128xf32, #tpu.memory_space<vmem>>, vector<128x128xf32>
    %c0_2 = arith.constant 0 : index
    %c0_3 = arith.constant 0 : index
    %4 = vector.load %arg2[%c0_2, %c0_3] : memref<128x128xbf16, #tpu.memory_space<vmem>>, vector<128x128xbf16>
    %c0_4 = arith.constant 0 : index
    %c0_5 = arith.constant 0 : index
    %5 = vector.load %arg3[%c0_4, %c0_5] : memref<128x128xbf16, #tpu.memory_space<vmem>>, vector<128x128xbf16>
    %cst = arith.constant dense<0.000000e+00> : vector<128x128xf32>
    %6 = tpu.matmul %4, %5, %cst {dimension_numbers = #tpu.dot_dimension_numbers<[1], [0], [0], [1], [0, 0, 1, 1], [], []>} : vector<128x128xbf16>, vector<128x128xbf16>, vector<128x128xf32> -> vector<128x128xf32>
    %7 = arith.addf %3, %6 : vector<128x128xf32>
    %c0_6 = arith.constant 0 : index
    %c0_7 = arith.constant 0 : index
    %8 = vector.load %arg6[%c0_6, %c0_7] : memref<128x128xf32, #tpu.memory_space<vmem>>, vector<128x128xf32>
    tpu.vector_store %arg6[%c0_6, %c0_7], %7 {strides = array<i32>} : memref<128x128xf32, #tpu.memory_space<vmem>>, vector<128x128xf32>,
    %c0_i32_8 = arith.constant 0 : i32
    %9 = arith.cmpi eq, %arg1, %c0_i32_8 : i32
    %10 = arith.extui %9 : i1 to i32
    %c0_i32_9 = arith.constant 0 : i32
    %11 = arith.cmpi ne, %10, %c0_i32_9 : i32
    scf.if %11 {
      %c0_10 = arith.constant 0 : index
      %c0_11 = arith.constant 0 : index
      %12 = vector.load %arg6[%c0_10, %c0_11] : memref<128x128xf32, #tpu.memory_space<vmem>>, vector<128x128xf32>
      %c0_12 = arith.constant 0 : index
      %c0_13 = arith.constant 0 : index
      %13 = vector.load %arg4[%c0_12, %c0_13] : memref<1x128xf32, #tpu.memory_space<vmem>>, vector<1x128xf32>
      %14 = vector.broadcast %13 : vector<1x128xf32> to vector<128x128xf32>
      %15 = arith.addf %12, %14 : vector<128x128xf32>
      %cst_14 = arith.constant 0.000000e+00 : f32
      %16 = vector.broadcast %cst_14 : f32 to vector<128x128xf32>
      %17 = arith.maximumf %15, %16 : vector<128x128xf32>
      %18 = arith.truncf %17 : vector<128x128xf32> to vector<128x128xbf16>
      %c0_15 = arith.constant 0 : index
      %c0_16 = arith.constant 0 : index
      %19 = vector.load %arg5[%c0_15, %c0_16] : memref<128x128xbf16, #tpu.memory_space<vmem>>, vector<128x128xbf16>
      tpu.vector_store %arg5[%c0_15, %c0_16], %18 {strides = array<i32>} : memref<128x128xbf16, #tpu.memory_space<vmem>>, vector<128x128xbf16>,
    } else {
    }
    return
  }
  func.func @transform_0(%arg0: i32, %arg1: i32) -> (i32, i32) {
    %c0_i32 = arith.constant 0 : i32
    return %arg0, %arg1 : i32, i32
  }
  func.func @transform_1(%arg0: i32, %arg1: i32) -> (i32, i32) {
    %c0_i32 = arith.constant 0 : i32
    %c0_i32_0 = arith.constant 0 : i32
    return %arg1, %c0_i32 : i32, i32
  }
  func.func @transform_2(%arg0: i32, %arg1: i32) -> (i32, i32) {
    %c0_i32 = arith.constant 0 : i32
    %c0_i32_0 = arith.constant 0 : i32
    %c0_i32_1 = arith.constant 0 : i32
    return %c0_i32, %c0_i32_0 : i32, i32
  }
  func.func @transform_3(%arg0: i32, %arg1: i32) -> (i32, i32) {
    %c0_i32 = arith.constant 0 : i32
    %c0_i32_0 = arith.constant 0 : i32
    return %arg0, %c0_i32 : i32, i32
  }
}

</mosaic_0001>

<bundles_post_ra>
// kernel: tpu_custom_call.1
= control target key start
LH: loop header
LB: loop body
LE: loop exit
PB: predicated region body
PF: predicated region fallthrough
CT: control target
= control target key end

     0   :  { %s1279_s0 = inlined_call_operand.hbm [shape: bf16[512,128], index: 0, kind: input, shape index: {}]   ;;  %s1280_s1 = inlined_call_operand.hbm [shape: bf16[128,128], index: 1, kind: input, shape index: {}]   ;;  %s1281_s2 = inlined_call_operand.vmem [shape: f32[1,128], index: 2, kind: input, shape index: {}]   ;;  %s1282_s3 = inlined_call_operand.hbm [shape: bf16[512,128], index: 3, kind: output, shape index: {}]  }
   0x1   :  { %1284 = sst [smem:[#allocation12_spill]] %s1280_s1 }
   0x2   :  { %8 = vsyncpa [#allocation4], 0 }
   0x3   :  { %10 = vsyncpa [#allocation4 + $0x1], 0 }
   0x4   :  { %11 = vsyncpa [#allocation7], 0 }
   0x5   :  { %12 = vsyncpa [#allocation5], 0 }
   0x6   :  { %14 = vsyncpa [#allocation5 + $0x1], 0  ;;  %s1098_s12 = smov 0   ;;  %s1100_s13 = smov 0  }
   0x7   :  { %s1102_s14 = smov 0   ;;  %s1104_s15 = smov 0  }
   0x8   :  { %s1106_s16 = smov 0   ;;  %s1108_s17 = smov 0  }
   0x9 LB: > { %s677_s18 = sadd.s32 4294967295, %s1071_s17   ;;  %s678_s19 = sadd.s32 4294967294, %s1071_s17   ;;  %s1071_s17 = sphi %s1108_s17, %s20_s17   ;;  %s1067_s16 = sphi %s1106_s16, %s1298_s16   ;;  %s1063_s15 = sphi %s1104_s15, %s1297_s15   ;;  %s1059_s14 = sphi %s1102_s14, %s1296_s14   ;;  %s1055_s13 = sphi %s1100_s13, %s1295_s13   ;;  %s1051_s12 = sphi %s1098_s12, %s1294_s12  }
   0xa   : > { %p54_p0 = scmp.ne.s32.totalorder %s1055_s13, %s1051_s12  ;;  %p1132_p1 = scmp.eq.s32.totalorder %s677_s18, 0 }
   0xb   : > { %p1136_p2 = scmp.eq.s32.totalorder %s677_s18, 3  ;;  %p131_p3 = scmp.eq.s32.totalorder %s678_s19, 3 }
   0xc   : > { %p1142_p4 = por %p1132_p1, %p54_p0  ;;  %p679_p5 = scmp.ge.s32.totalorder %s1071_s17, 1 }
   0xd   : > { %p1147_p6 = por %p131_p3, %p54_p0  ;;  %p138_p7 = scmp.lt.s32.totalorder %s1071_s17, 5 }
   0xe   : > { %s1289_s1 = sld [smem:[#allocation12_spill]]  ;;  %s1073_s28 = smov [#allocation6]  }
   0xf   : > { %p1155_p8 = pnand %p679_p5, %p138_p7  ;;  %s154_s29 = sshll.u32 %s1073_s28, 4  ;;  %s155_s29 = int_to_ptr.vmem [resolvable:$true] %s154_s29 }
  0x10   : > { %s1283_s30 = smov 64   ;;  %s1075_s4 = smov 4  }
  0x11   : > { %p855_p9 = pneg %p1155_p8  ;;  %s32_s5 = sadd.s32 1, %s1067_s16 }
  0x12   : > { %p34_p11 = scmp.ge.s32.totalorder %s32_s5, 4  ;;  %s41_s6 = sadd.s32 1, %s1059_s14 }
  0x13   : > { %p856_p10 = pnand %p855_p9, %p1132_p1  ;;  %p48_p12 = scmp.ne.s32.totalorder %s1059_s14, %s1055_s13 }
  0x14   : > { %s152_s26 = sshll.u32 %s1289_s1, 4  ;;  %p49_p13 = scmp.eq.s32.totalorder %s1071_s17, 0  ;;  %s153_s26 = int_to_ptr.hbm [resolvable:$true] %s152_s26 }
  0x15   : > { %858 = dma.hbm_to_vmem [thread:$0]  (!%p856_p10), %s153_s26, 1024, %s155_s29, [#allocation7], %s1283_s30, %s1283_s30, %s1075_s4  }
  0x16   : > { %s1300_s5 = smov (%p34_p11, %s32_s5), 0  ;;  %p1173_p0 = por %p49_p13, %p48_p12 }
  0x17   : > { %p1179_p3 = por %p1136_p2, %p48_p12  ;;  %s36_s9 = ssub.s32 %s1067_s16, %s1300_s5 }
  0x18   : > { %p868_p5 = scmp.lt.s32.totalorder %s1071_s17, 4  ;;  %p39_p7 = scmp.eq.s32.totalorder %s36_s9, 0 }
  0x19   : > { %s171_s10 = sand.u32 1, %s1059_s14   ;;  %s758_s19 = sshll.u32 %s1067_s16, 6 }
  0x1a   : > { %s682_s11 = sshll.u32 %s171_s10, 6  ;;  %s181_s26 = scalar_lea.hbm %s1279_s0, %s758_s19 }
  0x1b   : > { %s1188_s18 = scalar_select %p39_p7, %s1059_s14, %s41_s6  }
  0x1c   : > { %s175_s28 = scalar_lea.vmem [#allocation3], %s682_s11  ;;  %s182_s21 = sshll.u32 %s181_s26, 4  ;;  %s183_s21 = int_to_ptr.hbm [resolvable:$true] %s182_s21 }
  0x1d   : > { %s184_s29 = sshll.u32 %s175_s28, 4  ;;  %p860_p2 = pnand %p868_p5, %p1173_p0  ;;  %s185_s29 = int_to_ptr.vmem [resolvable:$true] %s184_s29 }
  0x1e   : > { %s172_s30 = scalar_lea.sflag [#allocation4], %s171_s10  ;;  %s1293_s1 = smov 64  }
  0x1f   : > { %862 = dma.hbm_to_vmem [thread:$0]  (!%p860_p2), %s183_s21, 1024, %s185_s29, %s172_s30, %s1293_s1, %s1293_s1, %s1075_s4  }
  0x20   : > { %196 = sbr.rel (%p1155_p8) target bundleno = 240 (0xf0), region = 32  ;;  %s1202_s6 = sand.u32 (!%p1155_p8), 1, %s1055_s13  }
  0x21   : > { %s686_s9 = sshll.u32 (!%p1155_p8), %s1202_s6, 6  ;;  %s199_s11 = scalar_lea.sflag (!%p1155_p8), [#allocation4], %s1202_s6 }
  0x22   : > { %s1208_s7 = scalar_lea.vmem (!%p1155_p8), [#allocation3], %s686_s9 }
  0x25   : > { %1038 = dma.done.wait (%p1142_p4), %s199_s11, 1024  }
  0x26   : > { %1040 = vsyncadd (%p1142_p4), %s199_s11, 4294966272 }
  0x27   : > { %1042 = dma.done.wait (%p1132_p1), [#allocation7], 1024  }
  0x28   : > { %1044 = vsyncadd (%p1132_p1), [#allocation7], 4294966272  ;;  %v774_v0 = vld [vmem:[#allocation6 + $0x38] sm:$0xff]  ;;  %v773_v1 = vld [vmem:[#allocation6 + $0x30] sm:$0xff]  ;;  %s1231_s22 = scalar_lea.vmem [#allocation8], %s686_s9  ;;  %s775_s27 = sshll.u32 %s1063_s15, 6 }
  0x29   : > { %398 = vmatpush.bf16.msra.mxu0 %v774_v0  ;;  %823 = vmatpush.bf16.msra.mxu1 %v774_v0  ;;  %v772_v2 = vld [vmem:[#allocation6 + $0x28] sm:$0xff]  ;;  %v771_v3 = vld [vmem:[#allocation6 + $0x20] sm:$0xff]  ;;  %v770_v4 = vld [vmem:[#allocation6 + $0x18] sm:$0xff]  ;;  %s578_s10 = scalar_lea.hbm %s1282_s3, %s775_s27  ;;  %s579_s19 = sshll.u32 %s1231_s22, 4  ;;  %s580_s19 = int_to_ptr.vmem [resolvable:$true] %s579_s19 }
  0x2a   : > { %824 = vmatpush.bf16.msra.mxu2 %v774_v0  ;;  %825 = vmatpush.bf16.msra.mxu3 %v774_v0  ;;  %v769_v5 = vld [vmem:[#allocation6 + $0x10] sm:$0xff]  ;;  %v768_v6 = vld [vmem:[#allocation6 + $0x8] sm:$0xff]  ;;  %v767_v7 = vld [vmem:[#allocation6] sm:$0xff]  ;;  %s581_s24 = sshll.u32 %s578_s10, 4  ;;  %s567_s15 = scalar_lea.sflag [#allocation5], %s1202_s6  ;;  %s582_s24 = int_to_ptr.hbm [resolvable:$true] %s581_s24 }
  0x2b   : > { %v759_v8 = vld [vmem:[%s1208_s7] sm:$0xff]  ;;  %v761_v9 = vld [vmem:[%s1208_s7 + $0x10] sm:$0xff]  ;;  %v760_v12 = vld [vmem:[%s1208_s7 + $0x8] sm:$0xff]  ;;  %s999_s25 = sshra.s32 %s582_s24, 4  ;;  %s1005_s21 = scalar_lea.hbm %s1282_s3, 256  ;;  %s1000_s25 = int_to_ptr.hbm [resolvable:$true] %s999_s25 }
  0x2c   : > { %v763_v10 = vld [vmem:[%s1208_s7 + $0x20] sm:$0xff]  ;;  %v765_v11 = vld [vmem:[%s1208_s7 + $0x30] sm:$0xff]  ;;  %v762_v13 = vld [vmem:[%s1208_s7 + $0x18] sm:$0xff]  ;;  %s1001_s26 = scalar_lea.hbm %s1000_s25, 64  ;;  %p1006_p9 = scmp.lt.s32.totalorder %s1000_s25, %s1282_s3 }
  0x2d   : > { %399 = vmatpush.bf16.msra.mxu0 %v773_v1  ;;  %826 = vmatpush.bf16.msra.mxu1 %v773_v1  ;;  %v764_v14 = vld [vmem:[%s1208_s7 + $0x28] sm:$0xff]  ;;  %v766_v15 = vld [vmem:[%s1208_s7 + $0x38] sm:$0xff]  ;;  %v924_v18 = vld [vmem:[%s1281_s2] ss:$0 sm:$0xff]  ;;  %p1002_p1 = scmp.ne.s32.totalorder %s1000_s25, %s1001_s26  ;;  %p1007_p10 = scmp.lt.s32.totalorder %s1005_s21, %s1001_s26 }
  0x2e   : > { %827 = vmatpush.bf16.msra.mxu2 %v773_v1  ;;  %828 = vmatpush.bf16.msra.mxu3 %v773_v1 }
  0x2f   : > { %p1003_p4 = pnand %p1002_p1, %p1179_p3  ;;  %p1008_p11 = por %p1007_p10, %p1006_p9 }
  0x31   : > { %400 = vmatpush.bf16.msra.mxu0 %v772_v2  ;;  %829 = vmatpush.bf16.msra.mxu1 %v772_v2  ;;  %p1004_p8 = pneg %p1003_p4 }
  0x32   : > { %830 = vmatpush.bf16.msra.mxu2 %v772_v2  ;;  %831 = vmatpush.bf16.msra.mxu3 %v772_v2 }
  0x33   : > { %p1009_p12 = pnand %p1008_p11, %p1004_p8 }
  0x35   : > { %401 = vmatpush.bf16.msra.mxu0 %v771_v3  ;;  %832 = vmatpush.bf16.msra.mxu1 %v771_v3 }
  0x36   : > { %833 = vmatpush.bf16.msra.mxu2 %v771_v3  ;;  %834 = vmatpush.bf16.msra.mxu3 %v771_v3 }
  0x39   : > { %402 = vmatpush.bf16.msra.mxu0 %v770_v4  ;;  %835 = vmatpush.bf16.msra.mxu1 %v770_v4 }
  0x3a   : > { %836 = vmatpush.bf16.msra.mxu2 %v770_v4  ;;  %837 = vmatpush.bf16.msra.mxu3 %v770_v4 }
  0x3d   : > { %403 = vmatpush.bf16.msra.mxu0 %v769_v5  ;;  %838 = vmatpush.bf16.msra.mxu1 %v769_v5 }
  0x3e   : > { %839 = vmatpush.bf16.msra.mxu2 %v769_v5  ;;  %840 = vmatpush.bf16.msra.mxu3 %v769_v5 }
  0x41   : > { %404 = vmatpush.bf16.msra.mxu0 %v768_v6  ;;  %841 = vmatpush.bf16.msra.mxu1 %v768_v6 }
  0x42   : > { %842 = vmatpush.bf16.msra.mxu2 %v768_v6  ;;  %843 = vmatpush.bf16.msra.mxu3 %v768_v6 }
  0x45   : > { %405 = vmatpush.bf16.msra.mxu0 %v767_v7  ;;  %844 = vmatpush.bf16.msra.mxu1 %v767_v7 }
  0x46   : > { %845 = vmatpush.bf16.msra.mxu2 %v767_v7  ;;  %846 = vmatpush.bf16.msra.mxu3 %v767_v7 }
  0x48   : > { %406 = vmatmul.bf16.vlgmr.msra.gmra.mxu0 %v759_v8  ;;  %416 = vmatmul.bf16.vlgmr.msra.gmra.mxu1 %v761_v9 }
  0x49   : > { %426 = vmatmul.bf16.vlgmr.msra.gmra.mxu2 %v763_v10  ;;  %436 = vmatmul.bf16.vlgmr.msra.gmra.mxu3 %v765_v11 }
  0x58   : > { %411 = vmatmul.bf16.gmra.mxu0 %v760_v12  ;;  %421 = vmatmul.bf16.gmra.mxu1 %v762_v13 }
  0x59   : > { %431 = vmatmul.bf16.gmra.mxu2 %v764_v14  ;;  %441 = vmatmul.bf16.gmra.mxu3 %v766_v15 }
  0xc5   : > { %v407_v16 = vpop.f32.mrf.mxu0  ;;  %v417_v17 = vpop.f32.mrf.mxu1 }
  0xc6   : > { %v502_v19 = vadd.f32 %v924_v18, %v407_v16  ;;  %v506_v20 = vadd.f32 %v924_v18, %v417_v17 }
  0xc8   : > { %v518_v27 = vmax.f32 %v502_v19, 0.0  ;;  %v522_v28 = vmax.f32 %v506_v20, 0.0 }
  0xcc   : > { %v427_v21 = vpop.f32.mrf.mxu2  ;;  %v437_v22 = vpop.f32.mrf.mxu3 }
  0xcd   : > { %v409_v23 = vpop.f32.mrf.mxu0  ;;  %v419_v24 = vpop.f32.mrf.mxu1  ;;  %v510_v33 = vadd.f32 %v924_v18, %v427_v21  ;;  %v514_v34 = vadd.f32 %v924_v18, %v437_v22 }
  0xce   : > { %v503_v25 = vadd.f32 %v924_v18, %v409_v23  ;;  %v507_v26 = vadd.f32 %v924_v18, %v419_v24 }
  0xcf   : > { %v526_v41 = vmax.f32 %v510_v33, 0.0  ;;  %v530_v42 = vmax.f32 %v514_v34, 0.0 }
  0xd0   : > { %v519_v29 = vmax.f32 %v503_v25, 0.0  ;;  %v523_v30 = vmax.f32 %v507_v26, 0.0 }
  0xd2   : > { %v779_v31 = vpack.c.bf16 %v519_v29, %v518_v27  ;;  %v789_v32 = vpack.c.bf16 %v523_v30, %v522_v28 }
  0xd4   : > { %780 = vst [vmem:[%s1231_s22] sm:$0xff] %v779_v31   ;;  %v429_v35 = vpop.f32.mrf.mxu2  ;;  %v439_v36 = vpop.f32.mrf.mxu3 }
  0xd5   : > { %817 = vst [vmem:[%s1231_s22 + $0x10] sm:$0xff] %v789_v32   ;;  %v511_v37 = vadd.f32 %v924_v18, %v429_v35  ;;  %v515_v38 = vadd.f32 %v924_v18, %v439_v36  ;;  %v412_v39 = vpop.f32.mrf.mxu0  ;;  %v422_v40 = vpop.f32.mrf.mxu1 }
  0xd6   : > { %v504_v47 = vadd.f32 %v924_v18, %v412_v39  ;;  %v508_v48 = vadd.f32 %v924_v18, %v422_v40 }
  0xd7   : > { %v527_v43 = vmax.f32 %v511_v37, 0.0  ;;  %v531_v44 = vmax.f32 %v515_v38, 0.0 }
  0xd8   : > { %v520_v55 = vmax.f32 %v504_v47, 0.0  ;;  %v524_v56 = vmax.f32 %v508_v48, 0.0 }
  0xd9   : > { %v799_v45 = vpack.c.bf16 %v527_v43, %v526_v41  ;;  %v809_v46 = vpack.c.bf16 %v531_v44, %v530_v42 }
  0xdb   : > { %819 = vst [vmem:[%s1231_s22 + $0x20] sm:$0xff] %v799_v45  }
  0xdc   : > { %821 = vst [vmem:[%s1231_s22 + $0x30] sm:$0xff] %v809_v46   ;;  %v432_v49 = vpop.f32.mrf.mxu2  ;;  %v442_v50 = vpop.f32.mrf.mxu3 }
  0xdd   : > { %v414_v51 = vpop.f32.mrf.mxu0  ;;  %v424_v52 = vpop.f32.mrf.mxu1  ;;  %v512_v61 = vadd.f32 %v924_v18, %v432_v49  ;;  %v516_v62 = vadd.f32 %v924_v18, %v442_v50 }
  0xde   : > { %v505_v53 = vadd.f32 %v924_v18, %v414_v51  ;;  %v509_v54 = vadd.f32 %v924_v18, %v424_v52 }
  0xdf   : > { %v528_v3 = vmax.f32 %v512_v61, 0.0  ;;  %v532_v4 = vmax.f32 %v516_v62, 0.0 }
  0xe0   : > { %v521_v57 = vmax.f32 %v505_v53, 0.0  ;;  %v525_v58 = vmax.f32 %v509_v54, 0.0 }
  0xe2   : > { %v784_v59 = vpack.c.bf16 %v521_v57, %v520_v55  ;;  %v794_v60 = vpack.c.bf16 %v525_v58, %v524_v56 }
  0xe4   : > { %816 = vst [vmem:[%s1231_s22 + $0x8] sm:$0xff] %v784_v59   ;;  %v434_v63 = vpop.f32.mrf.mxu2  ;;  %v444_v0 = vpop.f32.mrf.mxu3 }
  0xe5   : > { %818 = vst [vmem:[%s1231_s22 + $0x18] sm:$0xff] %v794_v60   ;;  %v513_v1 = vadd.f32 %v924_v18, %v434_v63  ;;  %v517_v2 = vadd.f32 %v924_v18, %v444_v0 }
  0xe7   : > { %v529_v5 = vmax.f32 %v513_v1, 0.0  ;;  %v533_v6 = vmax.f32 %v517_v2, 0.0 }
  0xe9   : > { %v804_v7 = vpack.c.bf16 %v529_v5, %v528_v3  ;;  %v814_v8 = vpack.c.bf16 %v533_v6, %v532_v4 }
  0xeb   : > { %820 = vst [vmem:[%s1231_s22 + $0x28] sm:$0xff] %v804_v7  }
  0xec   : > { %822 = vst [vmem:[%s1231_s22 + $0x38] sm:$0xff] %v814_v8  }
  0xed   : > { %1012 = shalt.err (!%p1009_p12)
}
  0xee   : > { %s1076_s6 = smov 64   ;;  %s1077_s7 = smov 4  }
  0xef   : > { %853 = dma.vmem_to_hbm [thread:$0]  (%p1179_p3), %s580_s19, 1024, %s582_s24, %s567_s15, %s1076_s6, %s1076_s6, %s1077_s7  }
  0xf0 PF: > { %p870_p13 = scmp.ge.s32.totalorder %s1071_s17, 2  ;;  %s596_s1 = sand.u32 1, %s1051_s12  }
  0xf1   : > { %s597_s20 = scalar_lea.sflag [#allocation5], %s596_s1 }
  0xf2   : > { %p864_p0 = pnand %p870_p13, %p1147_p6 }
  0xf4   : > { %p865_p5 = pneg %p864_p0 }
  0xf6   : > { %1046 = dma.done.wait (%p865_p5), %s597_s20, 1024  }
  0xf7   : > { %1048 = vsyncadd (%p865_p5), %s597_s20, 4294966272  ;;  %s20_s17 = sadd.s32 1, %s1071_s17   ;;  %s1294_s12 = smov %s1055_s13 }
  0xf8   : > { %p17_p7 = scmp.ge.s32.totalorder %s20_s17, 6   ;;  %s1295_s13 = smov %s1059_s14 }
  0xf9   : > { %s1296_s14 = smov %s1188_s18  ;;  %s1297_s15 = smov %s1067_s16 }
  0xfa   : > { %s1298_s16 = smov %s1300_s5  ;;  %19 = sbr.rel (!%p17_p7) target bundleno = 9 (0x9), region = 90 }
  0xff   :  { %603 = vsyncpa [#allocation4], 1 }
 0x100   :  { %605 = vsyncpa [#allocation4 + $0x1], 1 }
 0x101   :  { %606 = vsyncpa [#allocation7], 1 }
 0x102   :  { %607 = vsyncpa [#allocation5], 1 }
 0x103   :  { %609 = vsyncpa [#allocation5 + $0x1], 1 }

// kernel: tpu_custom_call.1
= control target key start
LH: loop header
LB: loop body
LE: loop exit
PB: predicated region body
PF: predicated region fallthrough
CT: control target
= control target key end

     0   :  { %s1279_s0 = inlined_call_operand.hbm [shape: bf16[512,128], index: 0, kind: input, shape index: {}]   ;;  %s1280_s1 = inlined_call_operand.hbm [shape: bf16[128,128], index: 1, kind: input, shape index: {}]   ;;  %s1281_s2 = inlined_call_operand.vmem [shape: f32[1,128], index: 2, kind: input, shape index: {}]   ;;  %s1282_s3 = inlined_call_operand.hbm [shape: bf16[512,128], index: 3, kind: output, shape index: {}]  }
   0x1   :  { %1284 = sst [smem:[#allocation12_spill]] %s1280_s1 }
   0x2   :  { %8 = vsyncpa [#allocation4], 0 }
   0x3   :  { %10 = vsyncpa [#allocation4 + $0x1], 0 }
   0x4   :  { %11 = vsyncpa [#allocation7], 0 }
   0x5   :  { %12 = vsyncpa [#allocation5], 0 }
   0x6   :  { %14 = vsyncpa [#allocation5 + $0x1], 0  ;;  %s1098_s12 = smov 0   ;;  %s1100_s13 = smov 0  }
   0x7   :  { %s1102_s14 = smov 0   ;;  %s1104_s15 = smov 0  }
   0x8   :  { %s1106_s16 = smov 0   ;;  %s1108_s17 = smov 0  }
   0x9 LB: > { %s677_s18 = sadd.s32 4294967295, %s1071_s17   ;;  %s678_s19 = sadd.s32 4294967294, %s1071_s17   ;;  %s1071_s17 = sphi %s1108_s17, %s20_s17   ;;  %s1067_s16 = sphi %s1106_s16, %s1298_s16   ;;  %s1063_s15 = sphi %s1104_s15, %s1297_s15   ;;  %s1059_s14 = sphi %s1102_s14, %s1296_s14   ;;  %s1055_s13 = sphi %s1100_s13, %s1295_s13   ;;  %s1051_s12 = sphi %s1098_s12, %s1294_s12  }
   0xa   : > { %p54_p0 = scmp.ne.s32.totalorder %s1055_s13, %s1051_s12  ;;  %p1132_p1 = scmp.eq.s32.totalorder %s677_s18, 0 }
   0xb   : > { %p1136_p2 = scmp.eq.s32.totalorder %s677_s18, 3  ;;  %p131_p3 = scmp.eq.s32.totalorder %s678_s19, 3 }
   0xc   : > { %p1142_p4 = por %p1132_p1, %p54_p0  ;;  %p679_p5 = scmp.ge.s32.totalorder %s1071_s17, 1 }
   0xd   : > { %p1147_p6 = por %p131_p3, %p54_p0  ;;  %p138_p7 = scmp.lt.s32.totalorder %s1071_s17, 5 }
   0xe   : > { %s1289_s1 = sld [smem:[#allocation12_spill]]  ;;  %s1073_s28 = smov [#allocation6]  }
   0xf   : > { %p1155_p8 = pnand %p679_p5, %p138_p7  ;;  %s154_s29 = sshll.u32 %s1073_s28, 4  ;;  %s155_s29 = int_to_ptr.vmem [resolvable:$true] %s154_s29 }
  0x10   : > { %s1283_s30 = smov 64   ;;  %s1075_s4 = smov 4  }
  0x11   : > { %p855_p9 = pneg %p1155_p8  ;;  %s32_s5 = sadd.s32 1, %s1067_s16 }
  0x12   : > { %p34_p11 = scmp.ge.s32.totalorder %s32_s5, 4  ;;  %s41_s6 = sadd.s32 1, %s1059_s14 }
  0x13   : > { %p856_p10 = pnand %p855_p9, %p1132_p1  ;;  %p48_p12 = scmp.ne.s32.totalorder %s1059_s14, %s1055_s13 }
  0x14   : > { %s152_s26 = sshll.u32 %s1289_s1, 4  ;;  %p49_p13 = scmp.eq.s32.totalorder %s1071_s17, 0  ;;  %s153_s26 = int_to_ptr.hbm [resolvable:$true] %s152_s26 }
  0x15   : > { %858 = dma.hbm_to_vmem [thread:$0]  (!%p856_p10), %s153_s26, 1024, %s155_s29, [#allocation7], %s1283_s30, %s1283_s30, %s1075_s4  }
  0x16   : > { %s1300_s5 = smov (%p34_p11, %s32_s5), 0  ;;  %p1173_p0 = por %p49_p13, %p48_p12 }
  0x17   : > { %p1179_p3 = por %p1136_p2, %p48_p12  ;;  %s36_s9 = ssub.s32 %s1067_s16, %s1300_s5 }
  0x18   : > { %p868_p5 = scmp.lt.s32.totalorder %s1071_s17, 4  ;;  %p39_p7 = scmp.eq.s32.totalorder %s36_s9, 0 }
  0x19   : > { %s171_s10 = sand.u32 1, %s1059_s14   ;;  %s758_s19 = sshll.u32 %s1067_s16, 6 }
  0x1a   : > { %s682_s11 = sshll.u32 %s171_s10, 6  ;;  %s181_s26 = scalar_lea.hbm %s1279_s0, %s758_s19 }
  0x1b   : > { %s1188_s18 = scalar_select %p39_p7, %s1059_s14, %s41_s6  }
  0x1c   : > { %s175_s28 = scalar_lea.vmem [#allocation3], %s682_s11  ;;  %s182_s21 = sshll.u32 %s181_s26, 4  ;;  %s183_s21 = int_to_ptr.hbm [resolvable:$true] %s182_s21 }
  0x1d   : > { %s184_s29 = sshll.u32 %s175_s28, 4  ;;  %p860_p2 = pnand %p868_p5, %p1173_p0  ;;  %s185_s29 = int_to_ptr.vmem [resolvable:$true] %s184_s29 }
  0x1e   : > { %s172_s30 = scalar_lea.sflag [#allocation4], %s171_s10  ;;  %s1293_s1 = smov 64  }
  0x1f   : > { %862 = dma.hbm_to_vmem [thread:$0]  (!%p860_p2), %s183_s21, 1024, %s185_s29, %s172_s30, %s1293_s1, %s1293_s1, %s1075_s4  }
  0x20   : > { %196 = sbr.rel (%p1155_p8) target bundleno = 240 (0xf0), region = 32  ;;  %s1202_s6 = sand.u32 (!%p1155_p8), 1, %s1055_s13  }
  0x21   : > { %s686_s9 = sshll.u32 (!%p1155_p8), %s1202_s6, 6  ;;  %s199_s11 = scalar_lea.sflag (!%p1155_p8), [#allocation4], %s1202_s6 }
  0x22   : > { %s1208_s7 = scalar_lea.vmem (!%p1155_p8), [#allocation3], %s686_s9 }
  0x25   : > { %1038 = dma.done.wait (%p1142_p4), %s199_s11, 1024  }
  0x26   : > { %1040 = vsyncadd (%p1142_p4), %s199_s11, 4294966272 }
  0x27   : > { %1042 = dma.done.wait (%p1132_p1), [#allocation7], 1024  }
  0x28   : > { %1044 = vsyncadd (%p1132_p1), [#allocation7], 4294966272  ;;  %v774_v0 = vld [vmem:[#allocation6 + $0x38] sm:$0xff]  ;;  %v773_v1 = vld [vmem:[#allocation6 + $0x30] sm:$0xff]  ;;  %s1231_s22 = scalar_lea.vmem [#allocation8], %s686_s9  ;;  %s775_s27 = sshll.u32 %s1063_s15, 6 }
  0x29   : > { %398 = vmatpush.bf16.msra.mxu0 %v774_v0  ;;  %823 = vmatpush.bf16.msra.mxu1 %v774_v0  ;;  %v772_v2 = vld [vmem:[#allocation6 + $0x28] sm:$0xff]  ;;  %v771_v3 = vld [vmem:[#allocation6 + $0x20] sm:$0xff]  ;;  %v770_v4 = vld [vmem:[#allocation6 + $0x18] sm:$0xff]  ;;  %s578_s10 = scalar_lea.hbm %s1282_s3, %s775_s27  ;;  %s579_s19 = sshll.u32 %s1231_s22, 4  ;;  %s580_s19 = int_to_ptr.vmem [resolvable:$true] %s579_s19 }
  0x2a   : > { %824 = vmatpush.bf16.msra.mxu2 %v774_v0  ;;  %825 = vmatpush.bf16.msra.mxu3 %v774_v0  ;;  %v769_v5 = vld [vmem:[#allocation6 + $0x10] sm:$0xff]  ;;  %v768_v6 = vld [vmem:[#allocation6 + $0x8] sm:$0xff]  ;;  %v767_v7 = vld [vmem:[#allocation6] sm:$0xff]  ;;  %s581_s24 = sshll.u32 %s578_s10, 4  ;;  %s567_s15 = scalar_lea.sflag [#allocation5], %s1202_s6  ;;  %s582_s24 = int_to_ptr.hbm [resolvable:$true] %s581_s24 }
  0x2b   : > { %v759_v8 = vld [vmem:[%s1208_s7] sm:$0xff]  ;;  %v761_v9 = vld [vmem:[%s1208_s7 + $0x10] sm:$0xff]  ;;  %v760_v12 = vld [vmem:[%s1208_s7 + $0x8] sm:$0xff]  ;;  %s999_s25 = sshra.s32 %s582_s24, 4  ;;  %s1005_s21 = scalar_lea.hbm %s1282_s3, 256  ;;  %s1000_s25 = int_to_ptr.hbm [resolvable:$true] %s999_s25 }
  0x2c   : > { %v763_v10 = vld [vmem:[%s1208_s7 + $0x20] sm:$0xff]  ;;  %v765_v11 = vld [vmem:[%s1208_s7 + $0x30] sm:$0xff]  ;;  %v762_v13 = vld [vmem:[%s1208_s7 + $0x18] sm:$0xff]  ;;  %s1001_s26 = scalar_lea.hbm %s1000_s25, 64  ;;  %p1006_p9 = scmp.lt.s32.totalorder %s1000_s25, %s1282_s3 }
  0x2d   : > { %399 = vmatpush.bf16.msra.mxu0 %v773_v1  ;;  %826 = vmatpush.bf16.msra.mxu1 %v773_v1  ;;  %v764_v14 = vld [vmem:[%s1208_s7 + $0x28] sm:$0xff]  ;;  %v766_v15 = vld [vmem:[%s1208_s7 + $0x38] sm:$0xff]  ;;  %v924_v18 = vld [vmem:[%s1281_s2] ss:$0 sm:$0xff]  ;;  %p1002_p1 = scmp.ne.s32.totalorder %s1000_s25, %s1001_s26  ;;  %p1007_p10 = scmp.lt.s32.totalorder %s1005_s21, %s1001_s26 }
  0x2e   : > { %827 = vmatpush.bf16.msra.mxu2 %v773_v1  ;;  %828 = vmatpush.bf16.msra.mxu3 %v773_v1 }
  0x2f   : > { %p1003_p4 = pnand %p1002_p1, %p1179_p3  ;;  %p1008_p11 = por %p1007_p10, %p1006_p9 }
  0x31   : > { %400 = vmatpush.bf16.msra.mxu0 %v772_v2  ;;  %829 = vmatpush.bf16.msra.mxu1 %v772_v2  ;;  %p1004_p8 = pneg %p1003_p4 }
  0x32   : > { %830 = vmatpush.bf16.msra.mxu2 %v772_v2  ;;  %831 = vmatpush.bf16.msra.mxu3 %v772_v2 }
  0x33   : > { %p1009_p12 = pnand %p1008_p11, %p1004_p8 }
  0x35   : > { %401 = vmatpush.bf16.msra.mxu0 %v771_v3  ;;  %832 = vmatpush.bf16.msra.mxu1 %v771_v3 }
  0x36   : > { %833 = vmatpush.bf16.msra.mxu2 %v771_v3  ;;  %834 = vmatpush.bf16.msra.mxu3 %v771_v3 }
  0x39   : > { %402 = vmatpush.bf16.msra.mxu0 %v770_v4  ;;  %835 = vmatpush.bf16.msra.mxu1 %v770_v4 }
  0x3a   : > { %836 = vmatpush.bf16.msra.mxu2 %v770_v4  ;;  %837 = vmatpush.bf16.msra.mxu3 %v770_v4 }
  0x3d   : > { %403 = vmatpush.bf16.msra.mxu0 %v769_v5  ;;  %838 = vmatpush.bf16.msra.mxu1 %v769_v5 }
  0x3e   : > { %839 = vmatpush.bf16.msra.mxu2 %v769_v5  ;;  %840 = vmatpush.bf16.msra.mxu3 %v769_v5 }
  0x41   : > { %404 = vmatpush.bf16.msra.mxu0 %v768_v6  ;;  %841 = vmatpush.bf16.msra.mxu1 %v768_v6 }
  0x42   : > { %842 = vmatpush.bf16.msra.mxu2 %v768_v6  ;;  %843 = vmatpush.bf16.msra.mxu3 %v768_v6 }
  0x45   : > { %405 = vmatpush.bf16.msra.mxu0 %v767_v7  ;;  %844 = vmatpush.bf16.msra.mxu1 %v767_v7 }
  0x46   : > { %845 = vmatpush.bf16.msra.mxu2 %v767_v7  ;;  %846 = vmatpush.bf16.msra.mxu3 %v767_v7 }
  0x48   : > { %406 = vmatmul.bf16.vlgmr.msra.gmra.mxu0 %v759_v8  ;;  %416 = vmatmul.bf16.vlgmr.msra.gmra.mxu1 %v761_v9 }
  0x49   : > { %426 = vmatmul.bf16.vlgmr.msra.gmra.mxu2 %v763_v10  ;;  %436 = vmatmul.bf16.vlgmr.msra.gmra.mxu3 %v765_v11 }
  0x58   : > { %411 = vmatmul.bf16.gmra.mxu0 %v760_v12  ;;  %421 = vmatmul.bf16.gmra.mxu1 %v762_v13 }
  0x59   : > { %431 = vmatmul.bf16.gmra.mxu2 %v764_v14  ;;  %441 = vmatmul.bf16.gmra.mxu3 %v766_v15 }
  0xc5   : > { %v407_v16 = vpop.f32.mrf.mxu0  ;;  %v417_v17 = vpop.f32.mrf.mxu1 }
  0xc6   : > { %v502_v19 = vadd.f32 %v924_v18, %v407_v16  ;;  %v506_v20 = vadd.f32 %v924_v18, %v417_v17 }
  0xc8   : > { %v518_v27 = vmax.f32 %v502_v19, 0.0  ;;  %v522_v28 = vmax.f32 %v506_v20, 0.0 }
  0xcc   : > { %v427_v21 = vpop.f32.mrf.mxu2  ;;  %v437_v22 = vpop.f32.mrf.mxu3 }
  0xcd   : > { %v409_v23 = vpop.f32.mrf.mxu0  ;;  %v419_v24 = vpop.f32.mrf.mxu1  ;;  %v510_v33 = vadd.f32 %v924_v18, %v427_v21  ;;  %v514_v34 = vadd.f32 %v924_v18, %v437_v22 }
  0xce   : > { %v503_v25 = vadd.f32 %v924_v18, %v409_v23  ;;  %v507_v26 = vadd.f32 %v924_v18, %v419_v24 }
  0xcf   : > { %v526_v41 = vmax.f32 %v510_v33, 0.0  ;;  %v530_v42 = vmax.f32 %v514_v34, 0.0 }
  0xd0   : > { %v519_v29 = vmax.f32 %v503_v25, 0.0  ;;  %v523_v30 = vmax.f32 %v507_v26, 0.0 }
  0xd2   : > { %v779_v31 = vpack.c.bf16 %v519_v29, %v518_v27  ;;  %v789_v32 = vpack.c.bf16 %v523_v30, %v522_v28 }
  0xd4   : > { %780 = vst [vmem:[%s1231_s22] sm:$0xff] %v779_v31   ;;  %v429_v35 = vpop.f32.mrf.mxu2  ;;  %v439_v36 = vpop.f32.mrf.mxu3 }
  0xd5   : > { %817 = vst [vmem:[%s1231_s22 + $0x10] sm:$0xff] %v789_v32   ;;  %v511_v37 = vadd.f32 %v924_v18, %v429_v35  ;;  %v515_v38 = vadd.f32 %v924_v18, %v439_v36  ;;  %v412_v39 = vpop.f32.mrf.mxu0  ;;  %v422_v40 = vpop.f32.mrf.mxu1 }
  0xd6   : > { %v504_v47 = vadd.f32 %v924_v18, %v412_v39  ;;  %v508_v48 = vadd.f32 %v924_v18, %v422_v40 }
  0xd7   : > { %v527_v43 = vmax.f32 %v511_v37, 0.0  ;;  %v531_v44 = vmax.f32 %v515_v38, 0.0 }
  0xd8   : > { %v520_v55 = vmax.f32 %v504_v47, 0.0  ;;  %v524_v56 = vmax.f32 %v508_v48, 0.0 }
  0xd9   : > { %v799_v45 = vpack.c.bf16 %v527_v43, %v526_v41  ;;  %v809_v46 = vpack.c.bf16 %v531_v44, %v530_v42 }
  0xdb   : > { %819 = vst [vmem:[%s1231_s22 + $0x20] sm:$0xff] %v799_v45  }
  0xdc   : > { %821 = vst [vmem:[%s1231_s22 + $0x30] sm:$0xff] %v809_v46   ;;  %v432_v49 = vpop.f32.mrf.mxu2  ;;  %v442_v50 = vpop.f32.mrf.mxu3 }
  0xdd   : > { %v414_v51 = vpop.f32.mrf.mxu0  ;;  %v424_v52 = vpop.f32.mrf.mxu1  ;;  %v512_v61 = vadd.f32 %v924_v18, %v432_v49  ;;  %v516_v62 = vadd.f32 %v924_v18, %v442_v50 }
  0xde   : > { %v505_v53 = vadd.f32 %v924_v18, %v414_v51  ;;  %v509_v54 = vadd.f32 %v924_v18, %v424_v52 }
  0xdf   : > { %v528_v3 = vmax.f32 %v512_v61, 0.0  ;;  %v532_v4 = vmax.f32 %v516_v62, 0.0 }
  0xe0   : > { %v521_v57 = vmax.f32 %v505_v53, 0.0  ;;  %v525_v58 = vmax.f32 %v509_v54, 0.0 }
  0xe2   : > { %v784_v59 = vpack.c.bf16 %v521_v57, %v520_v55  ;;  %v794_v60 = vpack.c.bf16 %v525_v58, %v524_v56 }
  0xe4   : > { %816 = vst [vmem:[%s1231_s22 + $0x8] sm:$0xff] %v784_v59   ;;  %v434_v63 = vpop.f32.mrf.mxu2  ;;  %v444_v0 = vpop.f32.mrf.mxu3 }
  0xe5   : > { %818 = vst [vmem:[%s1231_s22 + $0x18] sm:$0xff] %v794_v60   ;;  %v513_v1 = vadd.f32 %v924_v18, %v434_v63  ;;  %v517_v2 = vadd.f32 %v924_v18, %v444_v0 }
  0xe7   : > { %v529_v5 = vmax.f32 %v513_v1, 0.0  ;;  %v533_v6 = vmax.f32 %v517_v2, 0.0 }
  0xe9   : > { %v804_v7 = vpack.c.bf16 %v529_v5, %v528_v3  ;;  %v814_v8 = vpack.c.bf16 %v533_v6, %v532_v4 }
  0xeb   : > { %820 = vst [vmem:[%s1231_s22 + $0x28] sm:$0xff] %v804_v7  }
  0xec   : > { %822 = vst [vmem:[%s1231_s22 + $0x38] sm:$0xff] %v814_v8  }
  0xed   : > { %1012 = shalt.err (!%p1009_p12)
}
  0xee   : > { %s1076_s6 = smov 64   ;;  %s1077_s7 = smov 4  }
  0xef   : > { %853 = dma.vmem_to_hbm [thread:$0]  (%p1179_p3), %s580_s19, 1024, %s582_s24, %s567_s15, %s1076_s6, %s1076_s6, %s1077_s7  }
  0xf0 PF: > { %p870_p13 = scmp.ge.s32.totalorder %s1071_s17, 2  ;;  %s596_s1 = sand.u32 1, %s1051_s12  }
  0xf1   : > { %s597_s20 = scalar_lea.sflag [#allocation5], %s596_s1 }
  0xf2   : > { %p864_p0 = pnand %p870_p13, %p1147_p6 }
  0xf4   : > { %p865_p5 = pneg %p864_p0 }
  0xf6   : > { %1046 = dma.done.wait (%p865_p5), %s597_s20, 1024  }
  0xf7   : > { %1048 = vsyncadd (%p865_p5), %s597_s20, 4294966272  ;;  %s20_s17 = sadd.s32 1, %s1071_s17   ;;  %s1294_s12 = smov %s1055_s13 }
  0xf8   : > { %p17_p7 = scmp.ge.s32.totalorder %s20_s17, 6   ;;  %s1295_s13 = smov %s1059_s14 }
  0xf9   : > { %s1296_s14 = smov %s1188_s18  ;;  %s1297_s15 = smov %s1067_s16 }
  0xfa   : > { %s1298_s16 = smov %s1300_s5  ;;  %19 = sbr.rel (!%p17_p7) target bundleno = 9 (0x9), region = 90 }
  0xff   :  { %603 = vsyncpa [#allocation4], 1 }
 0x100   :  { %605 = vsyncpa [#allocation4 + $0x1], 1 }
 0x101   :  { %606 = vsyncpa [#allocation7], 1 }
 0x102   :  { %607 = vsyncpa [#allocation5], 1 }
 0x103   :  { %609 = vsyncpa [#allocation5 + $0x1], 1 }

</bundles_post_ra>
